<compile_context>
chip_gen: v7x
topology: tpu7x:2x2x1
jax: 0.10.0
libtpu: 0.0.40
codegen_flags: <defaults>
</compile_context>

<pallas_src>
import jax
import jax.numpy as jnp
from jax.experimental import pallas as pl
from jax.experimental.pallas import tpu as pltpu

_LANES = 128            # vreg lane width (fast axis)
_SUBLANES = 8           # f32 sublane granularity
_MAX_BLOCK_ROWS = 8192  # (8192, 128) f32 = 4 MiB/buffer -> 16 MiB double-buffered in+out
_SMALL_N = 32768        # below this, a fused XLA elementwise op beats any kernel launch


def _scale_shift_kernel(wb_ref, x_ref, o_ref):
    # wb_ref lives in SMEM: scalar-slot reads, effectively free.
    w = wb_ref[0]
    b = wb_ref[1]
    # Single fused VPU multiply-add over the whole lane-dense block.
    o_ref[...] = x_ref[...] * w + b


def _round_up(v: int, m: int) -> int:
    return ((v + m - 1) // m) * m


def _pallas_scale_shift(x_slab: jax.Array, wb: jax.Array) -> jax.Array:
    """Run the streaming kernel on a lane-dense [rows, 128] f32 slab."""
    rows, lanes = x_slab.shape
    assert lanes == _LANES

    # >= 2 grid steps (v7x megacore sharding), block rows a multiple of 8.
    block_rows = min(_MAX_BLOCK_ROWS, _round_up(pl.cdiv(rows, 2), _SUBLANES))
    block_rows = min(block_rows, _round_up(rows, _SUBLANES))
    grid = (pl.cdiv(rows, block_rows),)   # partial last block is masked by Pallas

    return pl.pallas_call(
        _scale_shift_kernel,
        out_shape=jax.ShapeDtypeStruct((rows, _LANES), x_slab.dtype),
        grid=grid,
        in_specs=[
            # (w, b) packed as a 1-D SMEM scalar pair, same block every step.
            pl.BlockSpec((2,), lambda i: (0,), memory_space=pltpu.MemorySpace.SMEM),
            # Lane-dense data tile, auto double-buffered HBM<->VMEM pipeline.
            pl.BlockSpec((block_rows, _LANES), lambda i: (i, 0)),
        ],
        out_specs=pl.BlockSpec((block_rows, _LANES), lambda i: (i, 0)),
        compiler_params=pltpu.CompilerParams(
            dimension_semantics=("parallel",),
            vmem_limit_bytes=32 << 20,
        ),
    )(wb, x_slab)


def simple_model_forward(x: jax.Array, weight: jax.Array, bias: jax.Array) -> jax.Array:
    """Pallas equivalent of SimpleModel.forward.

    x:      [N, 1] float32
    weight: [1, 1] float32  (nn.Linear weight, shape [out, in])
    bias:   [1]    float32
    """
    n, f = x.shape
    assert f == 1 and weight.shape == (1, 1) and bias.shape == (1,)
    assert x.dtype == jnp.float32, "kernel path assumes f32 (8-row sublane tiles)"

    w_scalar = weight.reshape(()).astype(jnp.float32)
    b_scalar = bias.reshape(()).astype(jnp.float32)

    # ---- tiny-N fast path: fused XLA elementwise, no kernel dispatch --------
    if n < _SMALL_N:
        return x * w_scalar + b_scalar

    wb = jnp.stack([w_scalar, b_scalar])          # (2,) f32 for SMEM

    x_flat = x.reshape(-1)                        # free bitcast of [N,1]
    n_bulk = (n // _LANES) * _LANES
    tail = n - n_bulk

    if tail == 0:
        # Common case: zero wrapper copies. [N,1] -> [rows,128] -> kernel -> [N,1]
        out_slab = _pallas_scale_shift(x_flat.reshape(n_bulk // _LANES, _LANES), wb)
        return out_slab.reshape(n, 1)

    # Ragged N: Pallas on the 128-aligned bulk, plain XLA on the <128-elem tail.
    # (The slice/concat cost a copy of the bulk; negligible vs. the pad+slice
    #  of the previous version and only taken for ragged batch sizes.)
    bulk = x_flat[:n_bulk].reshape(n_bulk // _LANES, _LANES)
    out_bulk = _pallas_scale_shift(bulk, wb).reshape(-1)
    out_tail = x_flat[n_bulk:] * w_scalar + b_scalar
    return jnp.concatenate([out_bulk, out_tail]).reshape(n, 1)


def _reference(x, weight, bias):
    return x @ weight.T + bias


if __name__ == "__main__":
    key = jax.random.PRNGKey(0)
    kx, kw, kb, kx2, kx3 = jax.random.split(key, 5)

    # Deterministic parameter init mimicking nn.Linear's U(-1/sqrt(in), 1/sqrt(in)).
    bound = 1.0  # 1 / sqrt(in_features=1)
    weight = jax.random.uniform(kw, (1, 1), minval=-bound, maxval=bound, dtype=jnp.float32)
    bias = jax.random.uniform(kb, (1,), minval=-bound, maxval=bound, dtype=jnp.float32)

    # 1) Small batch consistent with SimpleModel tests (batch=8) -> XLA fast path.
    x_small = jax.random.normal(kx, (8, 1), dtype=jnp.float32)
    out_small = jax.block_until_ready(simple_model_forward(x_small, weight, bias))
    assert out_small.shape == (8, 1)
    assert jnp.allclose(out_small, _reference(x_small, weight, bias), atol=1e-6)

    # 2) 128-aligned batch -> Pallas streaming kernel, grid of 2 blocks.
    x_big = jax.random.normal(kx2, (65536, 1), dtype=jnp.float32)
    out_big = jax.block_until_ready(simple_model_forward(x_big, weight, bias))
    assert out_big.shape == (65536, 1)
    assert jnp.allclose(out_big, _reference(x_big, weight, bias), atol=1e-6)

    # 3) Ragged batch -> Pallas bulk + XLA tail (also exercises partial-block masking).
    x_rag = jax.random.normal(kx3, (98560 + 37, 1), dtype=jnp.float32)
    out_rag = jax.block_until_ready(simple_model_forward(x_rag, weight, bias))
    assert out_rag.shape == x_rag.shape
    assert jnp.allclose(out_rag, _reference(x_rag, weight, bias), atol=1e-6)

    print("KERNEL_OK")
</pallas_src>

<mosaic_0001>
module attributes {stable_mosaic.version = 11 : i64} {
  func.func @_scale_shift_kernel(%arg0: i32, %arg1: memref<2xf32, #tpu.memory_space<smem>>, %arg2: memref<256x128xf32, #tpu.memory_space<vmem>>, %arg3: memref<256x128xf32, #tpu.memory_space<vmem>>) attributes {dimension_semantics = [#tpu.dimension_semantics<parallel>], iteration_bounds = array<i64: 2>, scalar_prefetch = 0 : i64, scratch_operands = 0 : i64, tpu.core_type = #tpu.core_type<tc>, window_params = [{transform_indices = @transform_0, window_bounds = array<i64: 2>}, {transform_indices = @transform_1, window_bounds = array<i64: 256, 128>}, {transform_indices = @transform_2, window_bounds = array<i64: 256, 128>}]} {
    %c0 = arith.constant 0 : index
    %0 = memref.load %arg1[%c0] : memref<2xf32, #tpu.memory_space<smem>>
    %c1 = arith.constant 1 : index
    %1 = memref.load %arg1[%c1] : memref<2xf32, #tpu.memory_space<smem>>
    %c0_0 = arith.constant 0 : index
    %c0_1 = arith.constant 0 : index
    %2 = vector.load %arg2[%c0_0, %c0_1] : memref<256x128xf32, #tpu.memory_space<vmem>>, vector<256x128xf32>
    %3 = vector.broadcast %0 : f32 to vector<256x128xf32>
    %4 = arith.mulf %2, %3 : vector<256x128xf32>
    %5 = vector.broadcast %1 : f32 to vector<256x128xf32>
    %6 = arith.addf %4, %5 : vector<256x128xf32>
    %c0_2 = arith.constant 0 : index
    %c0_3 = arith.constant 0 : index
    %7 = vector.load %arg3[%c0_2, %c0_3] : memref<256x128xf32, #tpu.memory_space<vmem>>, vector<256x128xf32>
    tpu.vector_store %arg3[%c0_2, %c0_3], %6 {strides = array<i32>} : memref<256x128xf32, #tpu.memory_space<vmem>>, vector<256x128xf32>,
    return
  }
  func.func @transform_0(%arg0: i32) -> i32 {
    %c0_i32 = arith.constant 0 : i32
    %c0_i32_0 = arith.constant 0 : i32
    return %c0_i32 : i32
  }
  func.func @transform_1(%arg0: i32) -> (i32, i32) {
    %c0_i32 = arith.constant 0 : i32
    %c0_i32_0 = arith.constant 0 : i32
    return %arg0, %c0_i32 : i32, i32
  }
  func.func @transform_2(%arg0: i32) -> (i32, i32) {
    %c0_i32 = arith.constant 0 : i32
    %c0_i32_0 = arith.constant 0 : i32
    return %arg0, %c0_i32 : i32, i32
  }
}

</mosaic_0001>

<bundles_post_ra>
// kernel: tpu_custom_call.1
= control target key start
LH: loop header
LB: loop body
LE: loop exit
PB: predicated region body
PF: predicated region fallthrough
CT: control target
= control target key end

     0   :  { %7 = vsyncpa [#allocation5], 0  ;;  %s955_s0 = inlined_call_operand.hbm [shape: f32[2], index: 0, kind: input, shape index: {}]   ;;  %s956_s1 = inlined_call_operand.hbm [shape: f32[512,128], index: 1, kind: input, shape index: {}]   ;;  %s957_s2 = inlined_call_operand.hbm [shape: f32[512,128], index: 2, kind: output, shape index: {}]  }
   0x1   :  { %8 = vsyncpa [#allocation3], 0 }
   0x2   :  { %10 = vsyncpa [#allocation3 + $0x1], 0 }
   0x3   :  { %11 = vsyncpa [#allocation4], 0 }
   0x4   :  { %13 = vsyncpa [#allocation4 + $0x1], 0  ;;  %s624_s9 = smov 0   ;;  %s626_s10 = smov 0  }
   0x5   :  { %s628_s11 = smov 0   ;;  %s630_s12 = smov 0  }
   0x6 LB: > { %s645_s13 = sadd.s32 4294967295, %s600_s12   ;;  %s407_s14 = sadd.s32 4294967294, %s600_s12   ;;  %s600_s12 = sphi %s630_s12, %s977_s12   ;;  %s596_s11 = sphi %s628_s11, %s976_s11   ;;  %s592_s10 = sphi %s626_s10, %s975_s10   ;;  %s588_s9 = sphi %s624_s9, %s974_s9  }
   0x7   : > { %s649_s15 = sadd.s32 1, %s600_s12   ;;  %s47_s16 = sadd.s32 1, %s596_s11 }
   0x8   : > { %s44_s17 = ssub.s32 %s600_s12, %s649_s15  ;;  %p54_p0 = scmp.ne.s32.totalorder %s596_s11, %s592_s10 }
   0x9   : > { %p45_p1 = scmp.eq.s32.totalorder %s44_s17, 0  ;;  %p55_p2 = scmp.eq.s32.totalorder %s600_s12, 0 }
   0xa   : > { %p60_p3 = scmp.ne.s32.totalorder %s592_s10, %s588_s9  ;;  %p958_p4 = scmp.eq.s32.totalorder %s645_s13, 0 }
   0xb   : > { %s661_s18 = scalar_select %p45_p1, %s596_s11, %s47_s16  }
   0xc   : > { %p663_p5 = por %p55_p2, %p54_p0  ;;  %p669_p6 = por %p958_p4, %p60_p3 }
   0xd   : > { %p84_p7 = scmp.eq.s32.totalorder %s645_s13, 1  ;;  %p90_p8 = scmp.eq.s32.totalorder %s407_s14, 1 }
   0xe   : > { %s962_s20 = scalar_select %p669_p6, 1, 0 }
   0xf   : > { %p408_p9 = scmp.ge.s32.totalorder %s600_s12, 1  ;;  %p97_p10 = scmp.lt.s32.totalorder %s600_s12, 3 }
  0x10   : > { %p676_p11 = por %p84_p7, %p54_p0  ;;  %p680_p12 = por %p90_p8, %p60_p3 }
  0x11   : > { %p684_p13 = pnand %p408_p9, %p97_p10  ;;  %p447_p4 = scmp.lt.s32.totalorder %s600_s12, 2 }
  0x12   : > { %s963_s21 = scalar_select %p676_p11, 1, 0 }
  0x13   : > { %s964_s22 = scalar_select %p680_p12, 1, 0 }
  0x14   : > { %p434_p2 = pneg %p684_p13  ;;  %s119_s24 = sand.u32 1, %s596_s11  }
  0x15   : > { %s424_s25 = sshll.u32 %s600_s12, 12  ;;  %p966_p6 = scmp.eq.s32.totalorder %s645_s13, 0 }
  0x16   : > { %p698_p7 = pnand %p447_p4, %p663_p5  ;;  %s411_s27 = sshll.u32 %s119_s24, 8 }
  0x17   : > { %p435_p0 = pnand %p434_p2, %p966_p6  ;;  %s487_s30 = scalar_lea.hbm %s955_s0, 16 }
  0x18   : > { %p488_p3 = scmp.ne.s32.totalorder %s955_s0, %s487_s30  ;;  %p494_p6 = scmp.lt.u32.totalorder %s487_s30, %s955_s0 }
  0x19   : > { %p489_p8 = pneg %p435_p0 }
  0x1b   : > { %p490_p9 = pnand %p489_p8, %p488_p3 }
  0x1d   : > { %p491_p10 = pneg %p490_p9 }
  0x1f   : > { %p496_p4 = pnand %p494_p6, %p491_p10 }
  0x21   : > { %499 = shalt.err (!%p496_p4)
}
  0x22   : > { %s602_s7 = smov [#allocation2]   ;;  %s717_s19 = scalar_lea.hbm %s956_s1, %s424_s25 }
  0x23   : > { %437 = dma.hbm_to_smem (!%p435_p0), %s955_s0, 16, %s602_s7, [#allocation5]  }
  0x24   : > { %s123_s28 = scalar_lea.vmem [#allocation6], %s411_s27  ;;  %s721_s30 = scalar_lea.sflag [#allocation3], %s119_s24 }
  0x25   : > { %s130_s29 = sshll.u32 %s123_s28, 4  ;;  %s500_s3 = scalar_lea.hbm %s717_s19, 4096  ;;  %s719_s29 = int_to_ptr.vmem [resolvable:$true] %s130_s29 }
  0x26   : > { %p501_p5 = scmp.ne.s32.totalorder %s717_s19, %s500_s3  ;;  %p502_p2 = pneg %p698_p7 }
  0x27   : > { %s505_s5 = scalar_lea.hbm %s956_s1, 8192  ;;  %p506_p8 = scmp.lt.u32.totalorder %s717_s19, %s956_s1 }
  0x28   : > { %p503_p0 = pnand %p502_p2, %p501_p5  ;;  %p507_p9 = scmp.lt.u32.totalorder %s505_s5, %s500_s3 }
  0x29   : > { %p509_p6 = scmp.lt.u32.totalorder %s500_s3, %s717_s19 }
  0x2a   : > { %p504_p3 = pneg %p503_p0  ;;  %p508_p10 = por %p507_p9, %p506_p8 }
  0x2c   : > { %p510_p4 = por %p509_p6, %p508_p10 }
  0x2e   : > { %p511_p1 = pnand %p510_p4, %p504_p3 }
  0x30   : > { %514 = shalt.err (!%p511_p1)
}
  0x31   : > { %s515_s24 = scalar_lea.vmem %s719_s29, 4096  ;;  %s603_s27 = smov [#allocation6]  }
  0x32   : > { %p516_p5 = scmp.ne.s32.totalorder %s719_s29, %s515_s24  ;;  %s520_s8 = sshll.u32 %s603_s27, 4  ;;  %s521_s8 = int_to_ptr.vmem [resolvable:$false] %s520_s8 }
  0x33   : > { %s522_s14 = scalar_lea.vmem %s521_s8, 8192  ;;  %p523_p11 = scmp.lt.s32.totalorder %s719_s29, %s521_s8 }
  0x34   : > { %p518_p0 = pnand %p516_p5, %p502_p2  ;;  %p524_p8 = scmp.lt.s32.totalorder %s522_s14, %s515_s24 }
  0x36   : > { %p519_p12 = pneg %p518_p0  ;;  %p525_p9 = por %p524_p8, %p523_p11 }
  0x38   : > { %p526_p10 = pnand %p525_p9, %p519_p12 }
  0x3a   : > { %529 = shalt.err (!%p526_p10)
}
  0x3b   : > { %s604_s16 = smov 128   ;;  %s605_s17 = smov 8  }
  0x3c   : > { %441 = dma.hbm_to_vmem [thread:$0]  (!%p698_p7), %s717_s19, 4096, %s719_s29, %s721_s30, %s604_s16, %s604_s16, %s605_s17  }
  0x3d   : > { %142 = sbr.rel (%p684_p13) target bundleno = 118 (0x76), region = 28  ;;  %p968_p1 = scmp.eq.s32.totalorder (!%p684_p13), %s645_s13, 0 }
  0x44   : > { %575 = dma.done.wait (%p968_p1), [#allocation5], 16   ;;  %p969_p2 = pmov %p968_p1 }
  0x45   : > { %s756_s28 = sand.u32 1, %s592_s10   ;;  %p970_p11 = scmp.ne.s32.totalorder %s962_s20, 0 }
  0x46   : > { %577 = vsyncadd (%p969_p2), [#allocation5], 4294967280  ;;  %s416_s3 = sshll.u32 %s756_s28, 8  ;;  %s149_s25 = scalar_lea.sflag [#allocation3], %s756_s28 }
  0x47   : > { %s762_s26 = scalar_lea.vmem [#allocation6], %s416_s3 }
  0x48   : > { %579 = dma.done.wait (%p970_p11), %s149_s25, 4096  }
  0x49   : > { %581 = vsyncadd (%p970_p11), %s149_s25, 4294963200 }
  0x4a   : > { %157 = sfence }
  0x4b   : > { %s176_s23 = sld [smem:[#allocation2]]  ;;  %s418_s19 = sld [smem:[#allocation2 + $0x1]]  ;;  %v178_v0 = vld [vmem:[%s762_s26] sm:$0xff]  ;;  %v179_v1 = vld [vmem:[%s762_s26 + $0x8] sm:$0xff]  ;;  %v180_v2 = vld [vmem:[%s762_s26 + $0x10] sm:$0xff] }
  0x4c   : > { %v181_v3 = vld [vmem:[%s762_s26 + $0x18] sm:$0xff]  ;;  %v182_v4 = vld [vmem:[%s762_s26 + $0x20] sm:$0xff]  ;;  %v183_v5 = vld [vmem:[%s762_s26 + $0x28] sm:$0xff]  ;;  %s805_s20 = scalar_lea.vmem [#allocation7], %s416_s3  ;;  %s425_s29 = sshll.u32 %s645_s13, 12 }
  0x4d   : > { %v184_v6 = vld [vmem:[%s762_s26 + $0x30] sm:$0xff]  ;;  %v185_v8 = vld [vmem:[%s762_s26 + $0x38] sm:$0xff]  ;;  %v186_v13 = vld [vmem:[%s762_s26 + $0x40] sm:$0xff]  ;;  %s322_s30 = sshll.u32 %s805_s20, 4  ;;  %s900_s5 = scalar_lea.hbm %s957_s2, %s425_s29  ;;  %s902_s30 = int_to_ptr.vmem [resolvable:$true] %s322_s30 }
  0x4e   : > { %v187_v18 = vld [vmem:[%s762_s26 + $0x48] sm:$0xff]  ;;  %v188_v19 = vld [vmem:[%s762_s26 + $0x50] sm:$0xff]  ;;  %v189_v20 = vld [vmem:[%s762_s26 + $0x58] sm:$0xff]  ;;  %s309_s6 = scalar_lea.sflag [#allocation4], %s756_s28  ;;  %s530_s7 = scalar_lea.vmem %s902_s30, 4096 }
  0x4f   : > { %v190_v25 = vld [vmem:[%s762_s26 + $0x60] sm:$0xff]  ;;  %v191_v26 = vld [vmem:[%s762_s26 + $0x68] sm:$0xff]  ;;  %v192_v27 = vld [vmem:[%s762_s26 + $0x70] sm:$0xff]  ;;  %p531_p12 = scmp.ne.s32.totalorder %s902_s30, %s530_s7  ;;  %p971_p13 = scmp.ne.s32.totalorder %s963_s21, 0 }
  0x50   : > { %v193_v32 = vld [vmem:[%s762_s26 + $0x78] sm:$0xff]  ;;  %v194_v37 = vld [vmem:[%s762_s26 + $0x80] sm:$0xff]  ;;  %v195_v42 = vld [vmem:[%s762_s26 + $0x88] sm:$0xff]  ;;  %s606_s24 = smov [#allocation7]  }
  0x51   : > { %v775_v7 = vstv %s176_s23  ;;  %v779_v10 = vstv %s418_s19  ;;  %v196_v43 = vld [vmem:[%s762_s26 + $0x90] sm:$0xff]  ;;  %v197_v44 = vld [vmem:[%s762_s26 + $0x98] sm:$0xff]  ;;  %p532_p7 = pnand %p531_p12, %p971_p13  ;;  %s534_s27 = sshll.u32 %s606_s24, 4  ;;  %s535_s27 = int_to_ptr.vmem [resolvable:$false] %s534_s27 }
  0x52   : > { %v211_v9 = vmul.f32 %v775_v7, %v178_v0  ;;  %v212_v11 = vmul.f32 %v775_v7, %v179_v1  ;;  %v213_v12 = vmul.f32 %v775_v7, %v180_v2  ;;  %v214_v14 = vmul.f32 %v775_v7, %v181_v3  ;;  %v198_v49 = vld [vmem:[%s762_s26 + $0xa0] sm:$0xff]  ;;  %v199_v50 = vld [vmem:[%s762_s26 + $0xa8] sm:$0xff]  ;;  %v200_v51 = vld [vmem:[%s762_s26 + $0xb0] sm:$0xff]  ;;  %s536_s8 = scalar_lea.vmem %s535_s27, 8192  ;;  %p537_p6 = scmp.lt.s32.totalorder %s902_s30, %s535_s27 }
  0x53   : > { %v215_v15 = vmul.f32 %v775_v7, %v182_v4  ;;  %v216_v16 = vmul.f32 %v775_v7, %v183_v5  ;;  %v217_v17 = vmul.f32 %v775_v7, %v184_v6  ;;  %v218_v24 = vmul.f32 %v775_v7, %v185_v8  ;;  %v201_v56 = vld [vmem:[%s762_s26 + $0xb8] sm:$0xff]  ;;  %v202_v61 = vld [vmem:[%s762_s26 + $0xc0] sm:$0xff]  ;;  %v203_v2 = vld [vmem:[%s762_s26 + $0xc8] sm:$0xff]  ;;  %p533_p3 = pneg %p532_p7  ;;  %p538_p4 = scmp.lt.s32.totalorder %s536_s8, %s530_s7 }
  0x54   : > { %v244_v21 = vadd.f32 %v779_v10, %v211_v9  ;;  %v245_v22 = vadd.f32 %v779_v10, %v212_v11  ;;  %v246_v23 = vadd.f32 %v779_v10, %v213_v12  ;;  %v247_v28 = vadd.f32 %v779_v10, %v214_v14  ;;  %v204_v3 = vld [vmem:[%s762_s26 + $0xd0] sm:$0xff]  ;;  %v205_v4 = vld [vmem:[%s762_s26 + $0xd8] sm:$0xff]  ;;  %v206_v11 = vld [vmem:[%s762_s26 + $0xe0] sm:$0xff] }
  0x55   : > { %v248_v29 = vadd.f32 %v779_v10, %v215_v15  ;;  %v249_v30 = vadd.f32 %v779_v10, %v216_v16  ;;  %v250_v31 = vadd.f32 %v779_v10, %v217_v17  ;;  %v251_v33 = vadd.f32 %v779_v10, %v218_v24  ;;  %v207_v12 = vld [vmem:[%s762_s26 + $0xe8] sm:$0xff]  ;;  %p539_p5 = por %p538_p4, %p537_p6 }
  0x56   : > { %276 = vst [vmem:[%s805_s20] sm:$0xff] %v244_v21  ;;  %277 = vst [vmem:[%s805_s20 + $0x8] sm:$0xff] %v245_v22  ;;  %v219_v34 = vmul.f32 %v775_v7, %v186_v13  ;;  %v220_v35 = vmul.f32 %v775_v7, %v187_v18  ;;  %v221_v36 = vmul.f32 %v775_v7, %v188_v19  ;;  %v208_v13 = vld [vmem:[%s762_s26 + $0xf0] sm:$0xff]  ;;  %v209_v18 = vld [vmem:[%s762_s26 + $0xf8] sm:$0xff] }
  0x57   : > { %278 = vst [vmem:[%s805_s20 + $0x10] sm:$0xff] %v246_v23  ;;  %279 = vst [vmem:[%s805_s20 + $0x18] sm:$0xff] %v247_v28  ;;  %v222_v38 = vmul.f32 %v775_v7, %v189_v20  ;;  %v223_v39 = vmul.f32 %v775_v7, %v190_v25  ;;  %v224_v40 = vmul.f32 %v775_v7, %v191_v26  ;;  %p540_p0 = pnand %p539_p5, %p533_p3 }
  0x58   : > { %280 = vst [vmem:[%s805_s20 + $0x20] sm:$0xff] %v248_v29  ;;  %281 = vst [vmem:[%s805_s20 + $0x28] sm:$0xff] %v249_v30  ;;  %v225_v41 = vmul.f32 %v775_v7, %v192_v27  ;;  %v252_v45 = vadd.f32 %v779_v10, %v219_v34  ;;  %v253_v46 = vadd.f32 %v779_v10, %v220_v35 }
  0x59   : > { %282 = vst [vmem:[%s805_s20 + $0x30] sm:$0xff] %v250_v31  ;;  %283 = vst [vmem:[%s805_s20 + $0x38] sm:$0xff] %v251_v33  ;;  %v254_v47 = vadd.f32 %v779_v10, %v221_v36  ;;  %v226_v48 = vmul.f32 %v775_v7, %v193_v32  ;;  %v255_v52 = vadd.f32 %v779_v10, %v222_v38 }
  0x5a   : > { %v256_v53 = vadd.f32 %v779_v10, %v223_v39  ;;  %v257_v54 = vadd.f32 %v779_v10, %v224_v40  ;;  %v258_v55 = vadd.f32 %v779_v10, %v225_v41  ;;  %284 = vst [vmem:[%s805_s20 + $0x40] sm:$0xff] %v252_v45  ;;  %285 = vst [vmem:[%s805_s20 + $0x48] sm:$0xff] %v253_v46 }
  0x5b   : > { %286 = vst [vmem:[%s805_s20 + $0x50] sm:$0xff] %v254_v47  ;;  %v259_v57 = vadd.f32 %v779_v10, %v226_v48  ;;  %v227_v58 = vmul.f32 %v775_v7, %v194_v37  ;;  %v228_v59 = vmul.f32 %v775_v7, %v195_v42  ;;  %v229_v60 = vmul.f32 %v775_v7, %v196_v43 }
  0x5c   : > { %287 = vst [vmem:[%s805_s20 + $0x58] sm:$0xff] %v255_v52  ;;  %288 = vst [vmem:[%s805_s20 + $0x60] sm:$0xff] %v256_v53  ;;  %v230_v62 = vmul.f32 %v775_v7, %v197_v44  ;;  %v231_v63 = vmul.f32 %v775_v7, %v198_v49  ;;  %v232_v0 = vmul.f32 %v775_v7, %v199_v50 }
  0x5d   : > { %289 = vst [vmem:[%s805_s20 + $0x68] sm:$0xff] %v257_v54  ;;  %290 = vst [vmem:[%s805_s20 + $0x70] sm:$0xff] %v258_v55  ;;  %v233_v1 = vmul.f32 %v775_v7, %v200_v51  ;;  %v260_v5 = vadd.f32 %v779_v10, %v227_v58  ;;  %v261_v6 = vadd.f32 %v779_v10, %v228_v59 }
  0x5e   : > { %291 = vst [vmem:[%s805_s20 + $0x78] sm:$0xff] %v259_v57  ;;  %v262_v8 = vadd.f32 %v779_v10, %v229_v60  ;;  %v234_v9 = vmul.f32 %v775_v7, %v201_v56  ;;  %v263_v14 = vadd.f32 %v779_v10, %v230_v62  ;;  %v264_v15 = vadd.f32 %v779_v10, %v231_v63 }
  0x5f   : > { %v265_v16 = vadd.f32 %v779_v10, %v232_v0  ;;  %v266_v17 = vadd.f32 %v779_v10, %v233_v1  ;;  %292 = vst [vmem:[%s805_s20 + $0x80] sm:$0xff] %v260_v5  ;;  %293 = vst [vmem:[%s805_s20 + $0x88] sm:$0xff] %v261_v6  ;;  %v235_v20 = vmul.f32 %v775_v7, %v202_v61 }
  0x60   : > { %294 = vst [vmem:[%s805_s20 + $0x90] sm:$0xff] %v262_v8  ;;  %v267_v19 = vadd.f32 %v779_v10, %v234_v9  ;;  %v236_v21 = vmul.f32 %v775_v7, %v203_v2  ;;  %v237_v22 = vmul.f32 %v775_v7, %v204_v3  ;;  %295 = vst [vmem:[%s805_s20 + $0x98] sm:$0xff] %v263_v14 }
  0x61   : > { %296 = vst [vmem:[%s805_s20 + $0xa0] sm:$0xff] %v264_v15  ;;  %297 = vst [vmem:[%s805_s20 + $0xa8] sm:$0xff] %v265_v16  ;;  %v238_v23 = vmul.f32 %v775_v7, %v205_v4  ;;  %v239_v24 = vmul.f32 %v775_v7, %v206_v11  ;;  %v240_v25 = vmul.f32 %v775_v7, %v207_v12 }
  0x62   : > { %298 = vst [vmem:[%s805_s20 + $0xb0] sm:$0xff] %v266_v17  ;;  %v241_v26 = vmul.f32 %v775_v7, %v208_v13  ;;  %299 = vst [vmem:[%s805_s20 + $0xb8] sm:$0xff] %v267_v19  ;;  %v268_v27 = vadd.f32 %v779_v10, %v235_v20  ;;  %v269_v28 = vadd.f32 %v779_v10, %v236_v21 }
  0x63   : > { %v270_v29 = vadd.f32 %v779_v10, %v237_v22  ;;  %v242_v30 = vmul.f32 %v775_v7, %v209_v18  ;;  %v271_v31 = vadd.f32 %v779_v10, %v238_v23  ;;  %v272_v32 = vadd.f32 %v779_v10, %v239_v24 }
  0x64   : > { %v273_v33 = vadd.f32 %v779_v10, %v240_v25  ;;  %v274_v34 = vadd.f32 %v779_v10, %v241_v26  ;;  %300 = vst [vmem:[%s805_s20 + $0xc0] sm:$0xff] %v268_v27  ;;  %301 = vst [vmem:[%s805_s20 + $0xc8] sm:$0xff] %v269_v28 }
  0x65   : > { %302 = vst [vmem:[%s805_s20 + $0xd0] sm:$0xff] %v270_v29  ;;  %v275_v7 = vadd.f32 %v779_v10, %v242_v30  ;;  %303 = vst [vmem:[%s805_s20 + $0xd8] sm:$0xff] %v271_v31 }
  0x66   : > { %304 = vst [vmem:[%s805_s20 + $0xe0] sm:$0xff] %v272_v32  ;;  %305 = vst [vmem:[%s805_s20 + $0xe8] sm:$0xff] %v273_v33 }
  0x67   : > { %306 = vst [vmem:[%s805_s20 + $0xf0] sm:$0xff] %v274_v34  ;;  %307 = vst [vmem:[%s805_s20 + $0xf8] sm:$0xff] %v275_v7 }
  0x68   : > { %543 = shalt.err (!%p540_p0)
}
  0x69   : > { %s544_s14 = scalar_lea.hbm %s900_s5, 4096  ;;  %s548_s3 = scalar_lea.hbm %s957_s2, 8192 }
  0x6a   : > { %p545_p8 = scmp.ne.s32.totalorder %s900_s5, %s544_s14  ;;  %p549_p1 = scmp.lt.u32.totalorder %s900_s5, %s957_s2 }
  0x6b   : > { %p550_p2 = scmp.lt.u32.totalorder %s548_s3, %s544_s14  ;;  %p552_p12 = scmp.lt.u32.totalorder %s544_s14, %s900_s5 }
  0x6c   : > { %p546_p9 = pnand %p545_p8, %p971_p13 }
  0x6d   : > { %p551_p11 = por %p550_p2, %p549_p1 }
  0x6e   : > { %p547_p10 = pneg %p546_p9 }
  0x6f   : > { %p553_p7 = por %p552_p12, %p551_p11 }
  0x71   : > { %p554_p3 = pnand %p553_p7, %p547_p10 }
  0x73   : > { %557 = shalt.err (!%p554_p3)
}
  0x74   : > { %s607_s23 = smov 128   ;;  %s608_s19 = smov 8  }
  0x75   : > { %432 = dma.vmem_to_hbm [thread:$0]  (%p971_p13), %s902_s30, 4096, %s900_s5, %s309_s6, %s607_s23, %s607_s23, %s608_s19  }
  0x76 PF: > { %s337_s20 = sand.u32 1, %s588_s9   ;;  %p972_p6 = scmp.ne.s32.totalorder %s964_s22, 0 }
  0x77   : > { %p973_p4 = scmp.ge.s32.totalorder %s600_s12, 2  ;;  %s338_s29 = scalar_lea.sflag [#allocation4], %s337_s20 }
  0x79   : > { %p443_p5 = pnand %p973_p4, %p972_p6 }
  0x7b   : > { %583 = dma.done.wait (!%p443_p5), %s338_s29, 4096  }
  0x7c   : > { %585 = vsyncadd (!%p443_p5), %s338_s29, 4294963200  ;;  %p16_p0 = scmp.ge.s32.totalorder %s649_s15, 4   ;;  %s974_s9 = smov %s592_s10 }
  0x7d   : > { %s975_s10 = smov %s596_s11  ;;  %s976_s11 = smov %s661_s18 }
  0x7e   : > { %s977_s12 = smov %s649_s15  ;;  %18 = sbr.rel (!%p16_p0) target bundleno = 6 (0x6), region = 78 }
  0x85   :  { %343 = vsyncpa [#allocation3], 1 }
  0x86   :  { %345 = vsyncpa [#allocation3 + $0x1], 1 }
  0x87   :  { %346 = vsyncpa [#allocation4], 1 }
  0x88   :  { %348 = vsyncpa [#allocation4 + $0x1], 1 }
  0x89   :  { %349 = vsyncpa [#allocation5], 1 }
  0x8a   :  { %351 = vsyncpa [#allocation5 + $0x1], 1 }

</bundles_post_ra>
